<compile_context>
chip_gen: v7x
topology: tpu7x:2x2x1
jax: 0.10.0
libtpu: 0.0.40
codegen_flags: <defaults>
</compile_context>

<pallas_src>
import functools

import jax
import jax.numpy as jnp
from jax.experimental import pallas as pl
from jax.experimental.pallas import tpu as pltpu

EPS = 1e-5
LANE = 128
SUBLANE = 8


def _round_up(x, m):
    return (x + m - 1) // m * m


def _pad2(a, rows, cols):
    pr, pc = rows - a.shape[0], cols - a.shape[1]
    if pr or pc:
        a = jnp.pad(a, ((0, pr), (0, pc)))
    return a


def _pass1_kernel(x_ref, w1_ref, b1_ref, h_ref, stats_ref, *, valid_rows, block_b):
    """h = x @ W1 + b1 for one batch tile, plus masked per-feature sum / sumsq."""
    h32 = jnp.dot(x_ref[...], w1_ref[...], preferred_element_type=jnp.float32)
    h32 = h32 + b1_ref[...].astype(jnp.float32)
    h_ref[...] = h32.astype(h_ref.dtype)

    # Mask batch-padding rows out of the BN statistics (f32 accumulation).
    row = pl.program_id(0) * block_b + jax.lax.broadcasted_iota(
        jnp.int32, h32.shape, 0)
    hm = jnp.where(row < valid_rows, h32, 0.0)
    s = jnp.sum(hm, axis=0, keepdims=True)        # (1, H)
    ss = jnp.sum(hm * hm, axis=0, keepdims=True)  # (1, H)
    stats_ref[...] = jnp.concatenate([s, ss], axis=0)[None]  # (1, 2, H)


def _pass2_kernel(h_ref, scale_ref, shift_ref, w2_ref, b2_ref, o_ref):
    """out = relu(h * scale + shift) @ W2 + b2 for one batch tile."""
    hn = h_ref[...].astype(jnp.float32) * scale_ref[...] + shift_ref[...]
    hidden = jnp.maximum(hn, 0.0).astype(w2_ref.dtype)
    out = jnp.dot(hidden, w2_ref[...], preferred_element_type=jnp.float32)
    out = out + b2_ref[...].astype(jnp.float32)
    o_ref[...] = out.astype(o_ref.dtype)


def prediction_mlp(x, w1, b1, gamma, beta, w2, b2, *, block_b=256):
    """SimSiam prediction MLP forward. Weights stored as [in_f, out_f]."""
    B, in_dim = x.shape
    hidden_dim = w1.shape[1]
    out_dim = w2.shape[1]

    # Lane-dense (multiple-of-128) feature padding; batch padded to the tile.
    in_p = _round_up(in_dim, LANE)
    hid_p = _round_up(hidden_dim, LANE)
    out_p = _round_up(out_dim, LANE)
    tb = min(block_b, _round_up(B, SUBLANE))
    b_p = _round_up(B, tb)
    n_bt = b_p // tb

    x_p = _pad2(x, b_p, in_p)
    w1_p = _pad2(w1, in_p, hid_p)
    b1_p = _pad2(b1.reshape(1, -1), 1, hid_p)
    w2_p = _pad2(w2, hid_p, out_p)
    b2_p = _pad2(b2.reshape(1, -1), 1, out_p)
    gamma_p = _pad2(gamma.reshape(1, -1).astype(jnp.float32), 1, hid_p)
    beta_p = _pad2(beta.reshape(1, -1).astype(jnp.float32), 1, hid_p)

    cparams = pltpu.CompilerParams(
        dimension_semantics=("parallel",),        # megacore / v7x 2-TC sharding
        vmem_limit_bytes=32 * 1024 * 1024,        # explicit (v5e default: 16 MiB)
    )
    itm = lambda a: a.dtype.itemsize

    # ---- pass 1: linear1 + BN partial statistics ---------------------------
    bytes1 = (x_p.size * itm(x_p) + w1_p.size * itm(w1_p) + b1_p.size * itm(b1_p)
              + b_p * hid_p * itm(x_p) + n_bt * 2 * hid_p * 4)
    h, stats_parts = pl.pallas_call(
        functools.partial(_pass1_kernel, valid_rows=B, block_b=tb),
        grid=(n_bt,),
        in_specs=[
            pl.BlockSpec((tb, in_p), lambda i: (i, 0)),
            pl.BlockSpec((in_p, hid_p), lambda i: (0, 0)),    # resident W1
            pl.BlockSpec((1, hid_p), lambda i: (0, 0)),       # resident b1
        ],
        out_specs=[
            pl.BlockSpec((tb, hid_p), lambda i: (i, 0)),
            pl.BlockSpec((1, 2, hid_p), lambda i: (i, 0, 0)),
        ],
        out_shape=[
            jax.ShapeDtypeStruct((b_p, hid_p), x.dtype),
            jax.ShapeDtypeStruct((n_bt, 2, hid_p), jnp.float32),
        ],
        compiler_params=cparams,
        cost_estimate=pl.CostEstimate(flops=int(2 * b_p * in_p * hid_p),
                                      transcendentals=0,
                                      bytes_accessed=int(bytes1)),
    )(x_p, w1_p, b1_p)

    # ---- tiny JAX glue: fold BN batch stats + affine into scale / shift ----
    sums = jnp.sum(stats_parts, axis=0)                 # (2, hid_p), f32
    mean = sums[0] / B
    var = jnp.maximum(sums[1] / B - mean * mean, 0.0)   # biased variance
    inv = jax.lax.rsqrt(var + EPS)
    scale = gamma_p * inv[None, :]                      # (1, hid_p) f32
    shift = beta_p - mean[None, :] * scale              # (1, hid_p) f32

    # ---- pass 2: normalize + ReLU + linear2 --------------------------------
    bytes2 = (b_p * hid_p * itm(h) + 2 * hid_p * 4 + w2_p.size * itm(w2_p)
              + b2_p.size * itm(b2_p) + b_p * out_p * 4)
    out = pl.pallas_call(
        _pass2_kernel,
        grid=(n_bt,),
        in_specs=[
            pl.BlockSpec((tb, hid_p), lambda i: (i, 0)),
            pl.BlockSpec((1, hid_p), lambda i: (0, 0)),       # resident scale
            pl.BlockSpec((1, hid_p), lambda i: (0, 0)),       # resident shift
            pl.BlockSpec((hid_p, out_p), lambda i: (0, 0)),   # resident W2
            pl.BlockSpec((1, out_p), lambda i: (0, 0)),       # resident b2
        ],
        out_specs=pl.BlockSpec((tb, out_p), lambda i: (i, 0)),
        out_shape=jax.ShapeDtypeStruct((b_p, out_p), jnp.float32),
        compiler_params=cparams,
        cost_estimate=pl.CostEstimate(flops=int(2 * b_p * hid_p * out_p),
                                      transcendentals=0,
                                      bytes_accessed=int(bytes2)),
    )(h, scale, shift, w2_p, b2_p)

    return out[:B, :out_dim]


def reference(x, w1, b1, gamma, beta, w2, b2):
    x, w1, b1, gamma, beta, w2, b2 = (a.astype(jnp.float32)
                                      for a in (x, w1, b1, gamma, beta, w2, b2))
    h = x @ w1 + b1
    mean = h.mean(axis=0, keepdims=True)
    var = ((h - mean) ** 2).mean(axis=0, keepdims=True)
    h = (h - mean) / jnp.sqrt(var + EPS) * gamma + beta
    h = jnp.maximum(h, 0.0)
    return h @ w2 + b2


def _make_inputs(key, B, in_dim, hidden_dim, out_dim, dtype):
    ks = jax.random.split(key, 7)
    x = jax.random.normal(ks[0], (B, in_dim), jnp.float32)
    bound1 = 1.0 / (in_dim ** 0.5)
    w1 = jax.random.uniform(ks[1], (in_dim, hidden_dim), jnp.float32, -bound1, bound1)
    b1 = jax.random.uniform(ks[2], (1, hidden_dim), jnp.float32, -bound1, bound1)
    gamma = jax.random.uniform(ks[3], (1, hidden_dim), jnp.float32, 0.5, 1.5)
    beta = jax.random.uniform(ks[4], (1, hidden_dim), jnp.float32, -0.5, 0.5)
    bound2 = 1.0 / (hidden_dim ** 0.5)
    w2 = jax.random.uniform(ks[5], (hidden_dim, out_dim), jnp.float32, -bound2, bound2)
    b2 = jax.random.uniform(ks[6], (1, out_dim), jnp.float32, -bound2, bound2)
    cast = lambda a: a.astype(dtype)
    return (cast(x), cast(w1), cast(b1), gamma, beta, cast(w2), cast(b2))


if __name__ == "__main__":
    # TODO(synk): BatchNorm running-stat (running_mean/var) tracking is a
    # training-time side effect and is not modeled; forward uses batch stats.
    key = jax.random.PRNGKey(0)
    k1, k2 = jax.random.split(key)

    # 1) f32, lane-aligned small shapes, multiple batch tiles (grid=(2,)).
    args = _make_inputs(k1, 128, 256, 128, 256, jnp.float32)
    out = jax.block_until_ready(prediction_mlp(*args, block_b=64))
    ref = reference(*args)
    assert out.shape == (128, 256)
    assert jnp.allclose(out, ref, atol=2e-3, rtol=2e-3), \
        float(jnp.max(jnp.abs(out - ref)))

    # 2) bf16 operands (bf16 MXU path, f32 accumulation) vs f32 reference.
    args_bf16 = _make_inputs(k1, 128, 256, 128, 256, jnp.bfloat16)
    out_bf16 = jax.block_until_ready(prediction_mlp(*args_bf16, block_b=64))
    ref_bf16 = reference(*args_bf16)
    assert jnp.allclose(out_bf16, ref_bf16, atol=5e-2, rtol=5e-2), \
        float(jnp.max(jnp.abs(out_bf16 - ref_bf16)))

    # 3) ragged / non-lane-aligned shapes exercise padding + stat masking.
    args_rag = _make_inputs(k2, 50, 96, 48, 80, jnp.float32)
    out_rag = jax.block_until_ready(prediction_mlp(*args_rag, block_b=64))
    ref_rag = reference(*args_rag)
    assert out_rag.shape == (50, 80)
    assert jnp.allclose(out_rag, ref_rag, atol=2e-3, rtol=2e-3), \
        float(jnp.max(jnp.abs(out_rag - ref_rag)))

    print("KERNEL_OK")
</pallas_src>

<mosaic_0001>
module attributes {stable_mosaic.version = 11 : i64} {
  func.func @_pass1_kernel(%arg0: i32, %arg1: memref<64x256xf32, #tpu.memory_space<vmem>>, %arg2: memref<256x128xf32, #tpu.memory_space<vmem>>, %arg3: memref<1x128xf32, #tpu.memory_space<vmem>>, %arg4: memref<64x128xf32, #tpu.memory_space<vmem>>, %arg5: memref<1x2x128xf32, #tpu.memory_space<vmem>>) attributes {dimension_semantics = [#tpu.dimension_semantics<parallel>], iteration_bounds = array<i64: 2>, scalar_prefetch = 0 : i64, scratch_operands = 0 : i64, tpu.core_type = #tpu.core_type<tc>, window_params = [{transform_indices = @transform_0, window_bounds = array<i64: 64, 256>}, {pipeline_mode = #tpu.pipeline_mode<synchronous>, transform_indices = @transform_1, window_bounds = array<i64: 256, 128>}, {pipeline_mode = #tpu.pipeline_mode<synchronous>, transform_indices = @transform_2, window_bounds = array<i64: 1, 128>}, {transform_indices = @transform_3, window_bounds = array<i64: 64, 128>}, {transform_indices = @transform_4, window_bounds = array<i64: 1, 2, 128>}]} {
    %c0 = arith.constant 0 : index
    %c0_0 = arith.constant 0 : index
    %0 = vector.load %arg1[%c0, %c0_0] : memref<64x256xf32, #tpu.memory_space<vmem>>, vector<64x256xf32>
    %c0_1 = arith.constant 0 : index
    %c0_2 = arith.constant 0 : index
    %1 = vector.load %arg2[%c0_1, %c0_2] : memref<256x128xf32, #tpu.memory_space<vmem>>, vector<256x128xf32>
    %cst = arith.constant dense<0.000000e+00> : vector<64x128xf32>
    %2 = tpu.matmul %0, %1, %cst {dimension_numbers = #tpu.dot_dimension_numbers<[1], [0], [0], [1], [0, 0, 1, 1], [], []>} : vector<64x256xf32>, vector<256x128xf32>, vector<64x128xf32> -> vector<64x128xf32>
    %c0_3 = arith.constant 0 : index
    %c0_4 = arith.constant 0 : index
    %3 = vector.load %arg3[%c0_3, %c0_4] : memref<1x128xf32, #tpu.memory_space<vmem>>, vector<1x128xf32>
    %4 = vector.broadcast %3 : vector<1x128xf32> to vector<64x128xf32>
    %5 = arith.addf %2, %4 : vector<64x128xf32>
    %c0_5 = arith.constant 0 : index
    %c0_6 = arith.constant 0 : index
    %6 = vector.load %arg4[%c0_5, %c0_6] : memref<64x128xf32, #tpu.memory_space<vmem>>, vector<64x128xf32>
    tpu.vector_store %arg4[%c0_5, %c0_6], %5 {strides = array<i32>} : memref<64x128xf32, #tpu.memory_space<vmem>>, vector<64x128xf32>,
    %c64_i32 = arith.constant 64 : i32
    %7 = arith.muli %arg0, %c64_i32 : i32
    %8 = tpu.iota {dimensions = array<i32: 0>} : vector<64x128xi32>
    %9 = vector.broadcast %7 : i32 to vector<64x128xi32>
    %10 = arith.addi %9, %8 : vector<64x128xi32>
    %c128_i32 = arith.constant 128 : i32
    %11 = vector.broadcast %c128_i32 : i32 to vector<64x128xi32>
    %12 = arith.cmpi slt, %10, %11 : vector<64x128xi32>
    %cst_7 = arith.constant 0.000000e+00 : f32
    %13 = vector.broadcast %cst_7 : f32 to vector<64x128xf32>
    %14 = arith.select %12, %5, %13 : vector<64x128xi1>, vector<64x128xf32>
    %cst_8 = arith.constant dense<0.000000e+00> : vector<128xf32>
    %15 = vector.multi_reduction <add>, %14, %cst_8 [0] : vector<64x128xf32> to vector<128xf32>
    %16 = vector.shape_cast %15 : vector<128xf32> to vector<1x128xf32>
    %17 = arith.mulf %14, %14 : vector<64x128xf32>
    %cst_9 = arith.constant dense<0.000000e+00> : vector<128xf32>
    %18 = vector.multi_reduction <add>, %17, %cst_9 [0] : vector<64x128xf32> to vector<128xf32>
    %19 = vector.shape_cast %18 : vector<128xf32> to vector<1x128xf32>
    %20 = tpu.concatenate %16, %19 in 0 : vector<1x128xf32>, vector<1x128xf32> -> vector<2x128xf32>
    %21 = vector.shape_cast %20 : vector<2x128xf32> to vector<1x2x128xf32>
    %c0_10 = arith.constant 0 : index
    %c0_11 = arith.constant 0 : index
    %c0_12 = arith.constant 0 : index
    %22 = vector.load %arg5[%c0_10, %c0_11, %c0_12] : memref<1x2x128xf32, #tpu.memory_space<vmem>>, vector<1x2x128xf32>
    tpu.vector_store %arg5[%c0_10, %c0_11, %c0_12], %21 {strides = array<i32>} : memref<1x2x128xf32, #tpu.memory_space<vmem>>, vector<1x2x128xf32>,
    return
  }
  func.func @transform_0(%arg0: i32) -> (i32, i32) {
    %c0_i32 = arith.constant 0 : i32
    %c0_i32_0 = arith.constant 0 : i32
    return %arg0, %c0_i32 : i32, i32
  }
  func.func @transform_1(%arg0: i32) -> (i32, i32) {
    %c0_i32 = arith.constant 0 : i32
    %c0_i32_0 = arith.constant 0 : i32
    %c0_i32_1 = arith.constant 0 : i32
    return %c0_i32, %c0_i32_0 : i32, i32
  }
  func.func @transform_2(%arg0: i32) -> (i32, i32) {
    %c0_i32 = arith.constant 0 : i32
    %c0_i32_0 = arith.constant 0 : i32
    %c0_i32_1 = arith.constant 0 : i32
    return %c0_i32, %c0_i32_0 : i32, i32
  }
  func.func @transform_3(%arg0: i32) -> (i32, i32) {
    %c0_i32 = arith.constant 0 : i32
    %c0_i32_0 = arith.constant 0 : i32
    return %arg0, %c0_i32 : i32, i32
  }
  func.func @transform_4(%arg0: i32) -> (i32, i32, i32) {
    %c0_i32 = arith.constant 0 : i32
    %c0_i32_0 = arith.constant 0 : i32
    %c0_i32_1 = arith.constant 0 : i32
    return %arg0, %c0_i32, %c0_i32_0 : i32, i32, i32
  }
}

</mosaic_0001>

<bundles_post_ra>
// kernel: tpu_custom_call.1
= control target key start
LH: loop header
LB: loop body
LE: loop exit
PB: predicated region body
PF: predicated region fallthrough
CT: control target
= control target key end

     0   :  { %10 = vsyncpa [#allocation3], 0  ;;  %s1325_s0 = inlined_call_operand.hbm [shape: f32[128,256], index: 0, kind: input, shape index: {}]   ;;  %s1326_s1 = inlined_call_operand.hbm [shape: f32[256,128], index: 1, kind: input, shape index: {}]   ;;  %s1327_s2 = inlined_call_operand.vmem [shape: f32[1,128], index: 2, kind: input, shape index: {}]   ;;  %s1328_s3 = inlined_call_operand.hbm [shape: f32[128,128], index: 3, kind: output, shape index: {0}]   ;;  %s1329_s4 = inlined_call_operand.hbm [shape: f32[2,2,128], index: 4, kind: output, shape index: {1}]  }
   0x1   :  { %12 = vsyncpa [#allocation3 + $0x1], 0 }
   0x2   :  { %13 = vsyncpa [#allocation6], 0 }
   0x3   :  { %14 = vsyncpa [#allocation4], 0 }
   0x4   :  { %16 = vsyncpa [#allocation4 + $0x1], 0 }
   0x5   :  { %17 = vsyncpa [#allocation9], 0 }
   0x6   :  { %19 = vsyncpa [#allocation9 + $0x1], 0  ;;  %s1026_s15 = smov 0   ;;  %s1028_s16 = smov 0  }
   0x7   :  { %s1030_s17 = smov 0   ;;  %s1032_s18 = smov 0  }
   0x8 LB: > { %s1047_s19 = sadd.s32 4294967295, %s989_s18   ;;  %s632_s20 = sadd.s32 4294967294, %s989_s18   ;;  %s989_s18 = sphi %s1032_s18, %s1349_s18   ;;  %s985_s17 = sphi %s1030_s17, %s1348_s17   ;;  %s981_s16 = sphi %s1028_s16, %s1347_s16   ;;  %s977_s15 = sphi %s1026_s15, %s1346_s15  }
   0x9   : > { %p45_p0 = scmp.ne.s32.totalorder %s981_s16, %s977_s15  ;;  %p1330_p1 = scmp.eq.s32.totalorder %s1047_s19, 0 }
   0xa   : > { %p117_p3 = scmp.eq.s32.totalorder %s632_s20, 1  ;;  %p633_p5 = scmp.ge.s32.totalorder %s989_s18, 1 }
   0xb   : > { %p1056_p4 = por %p1330_p1, %p45_p0  ;;  %p150_p7 = scmp.lt.s32.totalorder %s989_s18, 3 }
   0xc   : > { %p1061_p6 = por %p117_p3, %p45_p0  ;;  %s991_s24 = smov [#allocation5]  }
   0xd   : > { %s1333_s21 = scalar_select %p1056_p4, 1, 0 }
   0xe   : > { %s1334_s22 = scalar_select %p1061_p6, 1, 0 }
   0xf   : > { %p1066_p8 = pnand %p633_p5, %p150_p7  ;;  %s162_s25 = sshll.u32 %s991_s24, 4  ;;  %s1070_s25 = int_to_ptr.vmem [resolvable:$true] %s162_s25 }
  0x10   : > { %s1082_s27 = sadd.s32 1, %s989_s18   ;;  %s32_s28 = sadd.s32 1, %s985_s17 }
  0x11   : > { %s1335_s23 = scalar_select %p1066_p8, 1, 0 }
  0x12   : > { %p771_p9 = pneg %p1066_p8  ;;  %s29_s29 = ssub.s32 %s989_s18, %s1082_s27 }
  0x13   : > { %s829_s6 = scalar_lea.hbm %s1326_s1, 4096 }
  0x14   : > { %p1077_p11 = pnand %p771_p9, %p1330_p1  ;;  %p830_p12 = scmp.ne.s32.totalorder %s1326_s1, %s829_s6 }
  0x15   : > { %p836_p5 = scmp.lt.u32.totalorder %s829_s6, %s1326_s1 }
  0x16   : > { %p831_p13 = pneg %p1077_p11 }
  0x18   : > { %p832_p0 = pnand %p831_p13, %p830_p12 }
  0x1a   : > { %p833_p3 = pneg %p832_p0 }
  0x1c   : > { %p838_p7 = pnand %p836_p5, %p833_p3 }
  0x1e   : > { %841 = shalt.err (!%p838_p7)
}
  0x1f   : > { %s842_s11 = scalar_lea.vmem %s1070_s25, 4096  ;;  %p850_p2 = scmp.lt.s32.totalorder %s1070_s25, %s1070_s25 }
  0x20   : > { %p843_p9 = scmp.ne.s32.totalorder %s1070_s25, %s842_s11  ;;  %p851_p6 = scmp.lt.s32.totalorder %s842_s11, %s842_s11 }
  0x22   : > { %p845_p10 = pnand %p843_p9, %p831_p13  ;;  %p852_p4 = por %p851_p6, %p850_p2 }
  0x24   : > { %p846_p1 = pneg %p845_p10 }
  0x26   : > { %p853_p8 = pnand %p852_p4, %p846_p1 }
  0x28   : > { %856 = shalt.err (!%p853_p8)
}
  0x29   : > { %s992_s12 = smov 128   ;;  %s993_s13 = smov 8  }
  0x2a   : > { %774 = dma.hbm_to_vmem [thread:$0]  (!%p1077_p11), %s1326_s1, 4096, %s1070_s25, [#allocation6], %s992_s12, %s992_s12, %s993_s13  }
  0x2b   : > { %p30_p2 = scmp.eq.s32.totalorder %s29_s29, 0  ;;  %p39_p1 = scmp.ne.s32.totalorder %s985_s17, %s981_s16 }
  0x2c   : > { %p40_p4 = scmp.eq.s32.totalorder %s989_s18, 0  ;;  %p787_p6 = scmp.lt.s32.totalorder %s989_s18, 2 }
  0x2d   : > { %s1113_s24 = scalar_select %p30_p2, %s985_s17, %s32_s28  }
  0x2e   : > { %p41_p8 = por %p40_p4, %p39_p1  ;;  %p1337_p10 = scmp.eq.s32.totalorder %s1047_s19, 1 }
  0x2f   : > { %s179_s5 = sand.u32 1, %s985_s17   ;;  %s655_s6 = sshll.u32 %s989_s18, 11 }
  0x30   : > { %p1117_p12 = por %p1337_p10, %p39_p1  ;;  %s636_s7 = sshll.u32 %s179_s5, 7 }
  0x31   : > { %s1126_s9 = scalar_lea.hbm %s1325_s0, %s655_s6  ;;  %s183_s25 = scalar_lea.vmem [#allocation2], %s636_s7 }
  0x32   : > { %s191_s28 = sshll.u32 %s183_s25, 4  ;;  %p1128_p11 = pnand %p787_p6, %p41_p8  ;;  %s1132_s28 = int_to_ptr.vmem [resolvable:$true] %s191_s28 }
  0x33   : > { %s1134_s10 = scalar_lea.sflag [#allocation3], %s179_s5  ;;  %s857_s11 = scalar_lea.hbm %s1126_s9, 2048 }
  0x34   : > { %p858_p13 = scmp.ne.s32.totalorder %s1126_s9, %s857_s11  ;;  %p859_p0 = pneg %p1128_p11 }
  0x35   : > { %s862_s14 = scalar_lea.hbm %s1325_s0, 4096  ;;  %p863_p7 = scmp.lt.u32.totalorder %s1126_s9, %s1325_s0 }
  0x36   : > { %p860_p3 = pnand %p859_p0, %p858_p13  ;;  %p864_p9 = scmp.lt.u32.totalorder %s862_s14, %s857_s11 }
  0x37   : > { %p866_p1 = scmp.lt.u32.totalorder %s857_s11, %s1126_s9 }
  0x38   : > { %p861_p5 = pneg %p860_p3  ;;  %p865_p2 = por %p864_p9, %p863_p7 }
  0x3a   : > { %p867_p4 = por %p866_p1, %p865_p2 }
  0x3c   : > { %p868_p6 = pnand %p867_p4, %p861_p5 }
  0x3e   : > { %871 = shalt.err (!%p868_p6)
}
  0x3f   : > { %s872_s5 = scalar_lea.vmem %s1132_s28, 2048  ;;  %s994_s7 = smov [#allocation2]  }
  0x40   : > { %p873_p8 = scmp.ne.s32.totalorder %s1132_s28, %s872_s5  ;;  %s877_s26 = sshll.u32 %s994_s7, 4  ;;  %s878_s26 = int_to_ptr.vmem [resolvable:$false] %s877_s26 }
  0x41   : > { %s879_s8 = scalar_lea.vmem %s878_s26, 4096  ;;  %p880_p3 = scmp.lt.s32.totalorder %s1132_s28, %s878_s26 }
  0x42   : > { %p875_p10 = pnand %p873_p8, %p859_p0  ;;  %p881_p7 = scmp.lt.s32.totalorder %s879_s8, %s872_s5 }
  0x44   : > { %p876_p13 = pneg %p875_p10  ;;  %p882_p9 = por %p881_p7, %p880_p3 }
  0x46   : > { %p883_p2 = pnand %p882_p9, %p876_p13 }
  0x48   : > { %886 = shalt.err (!%p883_p2)
}
  0x49   : > { %s995_s25 = smov 256   ;;  %s996_s11 = smov 16  }
  0x4a   : > { %778 = dma.hbm_to_vmem [thread:$0]  (!%p1128_p11), %s1126_s9, 2048, %s1132_s28, %s1134_s10, %s995_s25, %s995_s25, %s996_s11  }
  0x4b   : > { %p1340_p0 = scmp.ne.s32.totalorder %s1335_s23, 0 }
  0x4c   : > { %s1165_s12 = sand.u32 (!%p1340_p0), 1, %s981_s16   ;;  %p1341_p5 = scmp.ne.s32.totalorder (!%p1340_p0), %s1333_s21, 0 }
  0x4d   : > { %203 = sbr.rel (%p1340_p0) target bundleno = 403 (0x193), region = 32  ;;  %s641_s13 = sshll.u32 (!%p1340_p0), %s1165_s12, 7 }
  0x4e   : > { %s206_s14 = scalar_lea.sflag (!%p1340_p0), [#allocation3], %s1165_s12  ;;  %s1169_s20 = scalar_lea.vmem (!%p1340_p0), [#allocation2], %s641_s13 }
  0x54   : > { %960 = dma.done.wait (%p1341_p5), %s206_s14, 2048  }
  0x55   : > { %962 = vsyncadd (%p1341_p5), %s206_s14, 4294965248  ;;  %p1342_p11 = scmp.eq.s32.totalorder %s1047_s19, 0 }
  0x57   : > { %964 = dma.done.wait (%p1342_p11), [#allocation6], 4096   ;;  %p1343_p1 = pmov %p1342_p11 }
  0x58   : > { %v277_v0 = vld [vmem:[#allocation5 + $0x80] sm:$0xff]  ;;  %v278_v1 = vld [vmem:[#allocation5 + $0x88] sm:$0xff]  ;;  %v279_v5 = vld [vmem:[#allocation5 + $0x90] sm:$0xff]  ;;  %s646_s21 = sshll.u32 %s1047_s19, 6  ;;  %s643_s23 = sshll.u32 %s1165_s12, 6 }
  0x59   : > { %966 = vsyncadd (%p1343_p1), [#allocation6], 4294963200  ;;  %v261_v2 = vld [vmem:[#allocation5] sm:$0xff]  ;;  %v713_v3 = vpack.c.bf16 %v278_v1, %v277_v0  ;;  %v262_v4 = vld [vmem:[#allocation5 + $0x8] sm:$0xff]  ;;  %v414_v0 = vlaneseq  ;;  %s1209_s29 = scalar_lea.vmem [#allocation7], %s643_s23  ;;  %s656_s6 = sshll.u32 %s1047_s19, 10 }
  0x5a   : > { %v280_v6 = vld [vmem:[#allocation5 + $0x98] sm:$0xff]  ;;  %v715_v7 = vpack.c.bf16 %v262_v4, %v261_v2  ;;  %v263_v9 = vld [vmem:[#allocation5 + $0x10] sm:$0xff]  ;;  %v281_v11 = vld [vmem:[#allocation5 + $0xa0] sm:$0xff]  ;;  %v1196_v2 = vstv %s646_s21  ;;  %s504_s10 = sshll.u32 %s1209_s29, 4  ;;  %s1240_s26 = scalar_lea.hbm %s1328_s3, %s656_s6  ;;  %s1229_s10 = int_to_ptr.vmem [resolvable:$true] %s504_s10 }
  0x5b   : > { %v717_v8 = vpack.c.bf16 %v280_v6, %v279_v5  ;;  %v264_v10 = vld [vmem:[#allocation5 + $0x18] sm:$0xff]  ;;  %714 = vmatprep.subr.bf16.mxu0 %v713_v3  ;;  %745 = vmatprep.subr.bf16.mxu1 %v713_v3  ;;  %v282_v12 = vld [vmem:[#allocation5 + $0xa8] sm:$0xff]  ;;  %v265_v15 = vld [vmem:[#allocation5 + $0x20] sm:$0xff]  ;;  %v415_v1 = vshrl.u32 %v414_v0, 7  ;;  %s486_s8 = scalar_lea.sflag [#allocation4], %s1165_s12  ;;  %s887_s25 = scalar_lea.vmem %s1229_s10, 1024 }
  0x5c   : > { %716 = vmatpush3.bf16.msra.mxu0 %v715_v7  ;;  %v719_v13 = vpack.c.bf16 %v264_v10, %v263_v9  ;;  %753 = vmatpush3.bf16.msra.mxu1 %v715_v7  ;;  %v721_v14 = vpack.c.bf16 %v282_v12, %v281_v11  ;;  %v266_v16 = vld [vmem:[#allocation5 + $0x28] sm:$0xff]  ;;  %v283_v17 = vld [vmem:[#allocation5 + $0xb0] sm:$0xff]  ;;  %v284_v18 = vld [vmem:[#allocation5 + $0xb8] sm:$0xff]  ;;  %p888_p4 = scmp.ne.s32.totalorder %s1229_s10, %s887_s25  ;;  %s997_s11 = smov [#allocation7]  }
  0x5d   : > { %718 = vmatprep.subr.bf16.mxu0 %v717_v8  ;;  %746 = vmatprep.subr.bf16.mxu1 %v717_v8  ;;  %v723_v19 = vpack.c.bf16 %v266_v16, %v265_v15  ;;  %v725_v20 = vpack.c.bf16 %v284_v18, %v283_v17  ;;  %v267_v21 = vld [vmem:[#allocation5 + $0x30] sm:$0xff]  ;;  %v268_v22 = vld [vmem:[#allocation5 + $0x38] sm:$0xff]  ;;  %v285_v23 = vld [vmem:[#allocation5 + $0xc0] sm:$0xff]  ;;  %v416_v3 = vadd.s32 8, %v415_v1  ;;  %v424_v8 = vadd.s32 %v1196_v2, %v415_v1  ;;  %s891_s13 = sshll.u32 %s997_s11, 4  ;;  %s892_s13 = int_to_ptr.vmem [resolvable:$false] %s891_s13 }
  0x5e   : > { %v286_v24 = vld [vmem:[#allocation5 + $0xc8] sm:$0xff]  ;;  %v727_v26 = vpack.c.bf16 %v268_v22, %v267_v21  ;;  %v269_v29 = vld [vmem:[#allocation5 + $0x40] sm:$0xff]  ;;  %v287_v31 = vld [vmem:[#allocation5 + $0xd0] sm:$0xff]  ;;  %v417_v10 = vadd.s32 16, %v415_v1  ;;  %v418_v22 = vadd.s32 24, %v415_v1  ;;  %p889_p6 = pnand %p888_p4, %p1117_p12  ;;  %s893_s14 = scalar_lea.vmem %s892_s13, 2048 }
  0x5f   : > { %v246_v25 = vld [vmem:[%s1169_s20 + $0x8] sm:$0xff]  ;;  %v729_v28 = vpack.c.bf16 %v286_v24, %v285_v23  ;;  %v288_v32 = vld [vmem:[#allocation5 + $0xd8] sm:$0xff]  ;;  %v271_v35 = vld [vmem:[#allocation5 + $0x50] sm:$0xff]  ;;  %vm432_vm0 = vcmp.lt.s32.totalorder %v424_v8, 128  ;;  %p894_p10 = scmp.lt.s32.totalorder %s1229_s10, %s892_s13  ;;  %p895_p13 = scmp.lt.s32.totalorder %s893_s14, %s887_s25 }
  0x60   : > { %720 = vmatpush3.bf16.msra.mxu0 %v719_v13  ;;  %754 = vmatpush3.bf16.msra.mxu1 %v719_v13  ;;  %v254_v27 = vld [vmem:[%s1169_s20 + $0x48] sm:$0xff]  ;;  %v733_v34 = vpack.c.bf16 %v288_v32, %v287_v31  ;;  %v272_v36 = vld [vmem:[#allocation5 + $0x58] sm:$0xff]  ;;  %v289_v37 = vld [vmem:[#allocation5 + $0xe0] sm:$0xff]  ;;  %v425_v13 = vadd.s32 %v1196_v2, %v416_v3  ;;  %v420_v32 = vadd.s32 40, %v415_v1  ;;  %p890_p8 = pneg %p889_p6 }
  0x61   : > { %722 = vmatprep.subr.bf16.mxu0 %v721_v14  ;;  %747 = vmatprep.subr.bf16.mxu1 %v721_v14  ;;  %v270_v30 = vld [vmem:[#allocation5 + $0x48] sm:$0xff]  ;;  %v735_v39 = vpack.c.bf16 %v272_v36, %v271_v35  ;;  %v273_v41 = vld [vmem:[#allocation5 + $0x60] sm:$0xff]  ;;  %v291_v43 = vld [vmem:[#allocation5 + $0xf0] sm:$0xff]  ;;  %p896_p3 = por %p895_p13, %p894_p10 }
  0x62   : > { %364 = vmatprep.mubr.f32.mxu0 %v246_v25  ;;  %384 = vmatprep.mubr.f32.mxu1 %v254_v27  ;;  %v731_v33 = vpack.c.bf16 %v270_v30, %v269_v29  ;;  %v290_v38 = vld [vmem:[#allocation5 + $0xe8] sm:$0xff]  ;;  %v292_v44 = vld [vmem:[#allocation5 + $0xf8] sm:$0xff]  ;;  %v275_v47 = vld [vmem:[#allocation5 + $0x70] sm:$0xff]  ;;  %vm433_vm1 = vcmp.lt.s32.totalorder %v425_v13, 128 }
  0x63   : > { %v737_v40 = vpack.c.bf16 %v290_v38, %v289_v37  ;;  %v274_v42 = vld [vmem:[#allocation5 + $0x68] sm:$0xff]  ;;  %v741_v46 = vpack.c.bf16 %v292_v44, %v291_v43  ;;  %v276_v48 = vld [vmem:[#allocation5 + $0x78] sm:$0xff]  ;;  %v245_v50 = vld [vmem:[%s1169_s20] sm:$0xff]  ;;  %v421_v38 = vadd.s32 48, %v415_v1  ;;  %p897_p7 = pnand %p896_p3, %p890_p8 }
  0x64   : > { %724 = vmatpush3.bf16.msra.mxu0 %v723_v19  ;;  %755 = vmatpush3.bf16.msra.mxu1 %v723_v19  ;;  %v739_v45 = vpack.c.bf16 %v274_v42, %v273_v41  ;;  %v743_v49 = vpack.c.bf16 %v276_v48, %v275_v47  ;;  %v253_v51 = vld [vmem:[%s1169_s20 + $0x40] sm:$0xff]  ;;  %v248_v52 = vld [vmem:[%s1169_s20 + $0x18] sm:$0xff]  ;;  %v247_v54 = vld [vmem:[%s1169_s20 + $0x10] sm:$0xff]  ;;  %v419_v19 = vadd.s32 32, %v415_v1  ;;  %v422_v42 = vadd.s32 56, %v415_v1 }
  0x65   : > { %726 = vmatprep.subr.bf16.mxu0 %v725_v20  ;;  %748 = vmatprep.subr.bf16.mxu1 %v725_v20  ;;  %v256_v53 = vld [vmem:[%s1169_s20 + $0x58] sm:$0xff]  ;;  %v255_v55 = vld [vmem:[%s1169_s20 + $0x50] sm:$0xff]  ;;  %v250_v56 = vld [vmem:[%s1169_s20 + $0x28] sm:$0xff]  ;;  %v426_v20 = vadd.s32 %v1196_v2, %v417_v10  ;;  %v429_v48 = vadd.s32 %v1196_v2, %v420_v32 }
  0x66   : > { %v258_v57 = vld [vmem:[%s1169_s20 + $0x68] sm:$0xff]  ;;  %v249_v58 = vld [vmem:[%s1169_s20 + $0x20] sm:$0xff]  ;;  %v252_v60 = vld [vmem:[%s1169_s20 + $0x38] sm:$0xff]  ;;  %v428_v30 = vadd.s32 %v1196_v2, %v419_v19 }
  0x67   : > { %v257_v59 = vld [vmem:[%s1169_s20 + $0x60] sm:$0xff]  ;;  %v260_v61 = vld [vmem:[%s1169_s20 + $0x78] sm:$0xff]  ;;  %v251_v62 = vld [vmem:[%s1169_s20 + $0x30] sm:$0xff]  ;;  %vm434_vm2 = vcmp.lt.s32.totalorder %v426_v20, 128  ;;  %vm437_vm5 = vcmp.lt.s32.totalorder %v429_v48, 128 }
  0x68   : > { %728 = vmatpush3.bf16.msra.mxu0 %v727_v26  ;;  %756 = vmatpush3.bf16.msra.mxu1 %v727_v26  ;;  %v259_v63 = vld [vmem:[%s1169_s20 + $0x70] sm:$0xff]  ;;  %v1202_v6 = vld [vmem:[%s1327_s2] ss:$0 sm:$0xff]  ;;  %vm436_vm3 = vcmp.lt.s32.totalorder %v428_v30, 128 }
  0x69   : > { %730 = vmatprep.subr.bf16.mxu0 %v729_v28  ;;  %749 = vmatprep.subr.bf16.mxu1 %v729_v28 }
  0x6c   : > { %732 = vmatpush3.bf16.msra.mxu0 %v731_v33  ;;  %757 = vmatpush3.bf16.msra.mxu1 %v731_v33  ;;  %v427_v33 = vadd.s32 %v1196_v2, %v418_v22 }
  0x6d   : > { %734 = vmatprep.subr.bf16.mxu0 %v733_v34  ;;  %750 = vmatprep.subr.bf16.mxu1 %v733_v34 }
  0x6e   : > { %vm435_vm4 = vcmp.lt.s32.totalorder %v427_v33, 128 }
  0x70   : > { %736 = vmatpush3.bf16.msra.mxu0 %v735_v39  ;;  %758 = vmatpush3.bf16.msra.mxu1 %v735_v39 }
  0x71   : > { %738 = vmatprep.subr.bf16.mxu0 %v737_v40  ;;  %751 = vmatprep.subr.bf16.mxu1 %v737_v40 }
  0x74   : > { %740 = vmatpush3.bf16.msra.mxu0 %v739_v45  ;;  %759 = vmatpush3.bf16.msra.mxu1 %v739_v45 }
  0x75   : > { %742 = vmatprep.subr.bf16.mxu0 %v741_v46  ;;  %752 = vmatprep.subr.bf16.mxu1 %v741_v46 }
  0x78   : > { %744 = vmatpush3.bf16.msra.mxu0 %v743_v49  ;;  %760 = vmatpush3.bf16.msra.mxu1 %v743_v49 }
  0x7b   : > { %365 = vmatmul.mubr.f32.vlgmr.msra.gmra.mrb[0].mxu0 %v245_v50  ;;  %385 = vmatmul.mubr.f32.vlgmr.msra.gmra.mrb[0].mxu1 %v253_v51 }
  0x7c   : > { %369 = vmatprep.mubr.f32.mxu0 %v248_v52  ;;  %389 = vmatprep.mubr.f32.mxu1 %v256_v53 }
  0x7f   : > { %370 = vmatmul.mubr.f32.gmra.mrb[2].mxu0 %v247_v54  ;;  %390 = vmatmul.mubr.f32.gmra.mrb[2].mxu1 %v255_v55 }
  0x80   : > { %374 = vmatprep.mubr.f32.mxu0 %v250_v56  ;;  %394 = vmatprep.mubr.f32.mxu1 %v258_v57  ;;  %v430_v56 = vadd.s32 %v1196_v2, %v421_v38  ;;  %v431_v57 = vadd.s32 %v1196_v2, %v422_v42 }
  0x82   : > { %vm438_vm6 = vcmp.lt.s32.totalorder %v430_v56, 128  ;;  %vm439_vm7 = vcmp.lt.s32.totalorder %v431_v57, 128 }
  0x83   : > { %375 = vmatmul.mubr.f32.gmra.mrb[4].mxu0 %v249_v58  ;;  %395 = vmatmul.mubr.f32.gmra.mrb[4].mxu1 %v257_v59 }
  0x84   : > { %379 = vmatprep.mubr.f32.mxu0 %v252_v60  ;;  %399 = vmatprep.mubr.f32.mxu1 %v260_v61 }
  0x87   : > { %380 = vmatmul.mubr.f32.gmra.mrb[6].mxu0 %v251_v62  ;;  %400 = vmatmul.mubr.f32.gmra.mrb[6].mxu1 %v259_v63 }
 0x14e   : > { %v689_v4 = vpop.f32.mrb[0].mxu0  ;;  %v701_v5 = vpop.f32.mrb[0].mxu1 }
 0x14f   : > { %v690_v7 = vpop.f32.mrb[1].mxu0  ;;  %v702_v9 = vpop.f32.mrb[1].mxu1 }
 0x150   : > { %v691_v11 = vadd.f32 %v690_v7, %v689_v4  ;;  %v703_v12 = vadd.f32 %v702_v9, %v701_v5 }
 0x152   : > { %v367_v14 = vadd.f32 %v691_v11, %v1202_v6  ;;  %v692_v15 = vpop.f32.mrb[2].mxu0  ;;  %v387_v16 = vadd.f32 %v703_v12, %v1202_v6  ;;  %v704_v17 = vpop.f32.mrb[2].mxu1 }
 0x153   : > { %v693_v18 = vpop.f32.mrb[3].mxu0  ;;  %v705_v21 = vpop.f32.mrb[3].mxu1 }
 0x154   : > { %405 = vst [vmem:[%s1209_s29] sm:$0xff] %v367_v14  ;;  %v694_v23 = vadd.f32 %v693_v18, %v692_v15  ;;  %409 = vst [vmem:[%s1209_s29 + $0x20] sm:$0xff] %v387_v16  ;;  %v706_v24 = vadd.f32 %v705_v21, %v704_v17  ;;  %v440_v25 = vsel %vm432_vm0, %v367_v14, 0.0  ;;  %v444_v61 = vsel %vm436_vm3, %v387_v16, 0.0 }
 0x155   : > { %v461_v39 = vmul.f32 %v440_v25, %v440_v25 }
 0x156   : > { %v372_v26 = vadd.f32 %v694_v23, %v1202_v6  ;;  %v695_v27 = vpop.f32.mrb[4].mxu0  ;;  %v1215_v28 = vadd.f32 %v706_v24, %v1202_v6  ;;  %v707_v29 = vpop.f32.mrb[4].mxu1 }
 0x157   : > { %v696_v31 = vpop.f32.mrb[5].mxu0  ;;  %v708_v34 = vpop.f32.mrb[5].mxu1 }
 0x158   : > { %406 = vst [vmem:[%s1209_s29 + $0x8] sm:$0xff] %v372_v26  ;;  %v441_v35 = vsel %vm433_vm1, %v372_v26, 0.0  ;;  %v697_v36 = vadd.f32 %v696_v31, %v695_v27  ;;  %410 = vst [vmem:[%s1209_s29 + $0x28] sm:$0xff] %v1215_v28  ;;  %v709_v37 = vadd.f32 %v708_v34, %v707_v29 }
 0x159   : > { %v448_v40 = vadd.f32 %v441_v35, %v440_v25  ;;  %v462_v41 = vmul.f32 %v441_v35, %v441_v35 }
 0x15a   : > { %v377_v43 = vadd.f32 %v697_v36, %v1202_v6  ;;  %v698_v44 = vpop.f32.mrb[6].mxu0  ;;  %v1225_v45 = vadd.f32 %v709_v37, %v1202_v6  ;;  %v710_v46 = vpop.f32.mrb[6].mxu1 }
 0x15b   : > { %v469_v47 = vadd.f32 %v462_v41, %v461_v39  ;;  %v699_v49 = vpop.f32.mrb[7].mxu0  ;;  %v711_v50 = vpop.f32.mrb[7].mxu1 }
 0x15c   : > { %407 = vst [vmem:[%s1209_s29 + $0x10] sm:$0xff] %v377_v43  ;;  %v442_v51 = vsel %vm434_vm2, %v377_v43, 0.0  ;;  %v700_v52 = vadd.f32 %v699_v49, %v698_v44  ;;  %411 = vst [vmem:[%s1209_s29 + $0x30] sm:$0xff] %v1225_v45  ;;  %v712_v53 = vadd.f32 %v711_v50, %v710_v46 }
 0x15d   : > { %v449_v54 = vadd.f32 %v448_v40, %v442_v51  ;;  %v463_v55 = vmul.f32 %v442_v51, %v442_v51 }
 0x15e   : > { %v382_v58 = vadd.f32 %v700_v52, %v1202_v6  ;;  %v402_v59 = vadd.f32 %v712_v53, %v1202_v6 }
 0x15f   : > { %v470_v60 = vadd.f32 %v469_v47, %v463_v55 }
 0x160   : > { %408 = vst [vmem:[%s1209_s29 + $0x18] sm:$0xff] %v382_v58  ;;  %v443_v62 = vsel %vm435_vm4, %v382_v58, 0.0  ;;  %412 = vst [vmem:[%s1209_s29 + $0x38] sm:$0xff] %v402_v59 }
 0x161   : > { %v450_v63 = vadd.f32 %v449_v54, %v443_v62  ;;  %v464_v0 = vmul.f32 %v443_v62, %v443_v62 }
 0x162   : > { %900 = shalt.err (!%p897_p7)
}
 0x163   : > { %s901_s20 = scalar_lea.hbm %s1240_s26, 1024  ;;  %s905_s9 = scalar_lea.hbm %s1328_s3, 2048 }
 0x164   : > { %p902_p9 = scmp.ne.s32.totalorder %s1240_s26, %s901_s20  ;;  %p906_p5 = scmp.lt.u32.totalorder %s1240_s26, %s1328_s3 }
 0x165   : > { %p907_p11 = scmp.lt.u32.totalorder %s905_s9, %s901_s20  ;;  %p909_p4 = scmp.lt.u32.totalorder %s901_s20, %s1240_s26 }
 0x166   : > { %p903_p2 = pnand %p902_p9, %p1117_p12 }
 0x167   : > { %p908_p1 = por %p907_p11, %p906_p5 }
 0x168   : > { %p904_p0 = pneg %p903_p2 }
 0x169   : > { %p910_p6 = por %p909_p4, %p908_p1 }
 0x16b   : > { %p911_p8 = pnand %p910_p6, %p904_p0 }
 0x16d   : > { %914 = shalt.err (!%p911_p8)
}
 0x16e   : > { %s998_s6 = smov 128   ;;  %s999_s5 = smov 8   ;;  %v445_v1 = vsel %vm437_vm5, %v1215_v28, 0.0  ;;  %v465_v2 = vmul.f32 %v444_v61, %v444_v61  ;;  %v451_v3 = vadd.f32 %v450_v63, %v444_v61  ;;  %v471_v4 = vadd.f32 %v470_v60, %v464_v0 }
 0x16f   : > { %767 = dma.vmem_to_hbm [thread:$0]  (%p1117_p12), %s1229_s10, 1024, %s1240_s26, %s486_s8, %s998_s6, %s998_s6, %s999_s5   ;;  %v446_v5 = vsel %vm438_vm6, %v1225_v45, 0.0  ;;  %v447_v6 = vsel %vm439_vm7, %v402_v59, 0.0  ;;  %v466_v7 = vmul.f32 %v445_v1, %v445_v1  ;;  %vm482_vm8 = vcmask 1040384  }
 0x170   : > { %v472_v8 = vadd.f32 %v471_v4, %v465_v2  ;;  %v452_v9 = vadd.f32 %v451_v3, %v445_v1  ;;  %v467_v11 = vmul.f32 %v446_v5, %v446_v5  ;;  %v468_v13 = vmul.f32 %v447_v6, %v447_v6  ;;  %s644_s10 = sshll.u32 %s1165_s12, 1  ;;  %s651_s7 = sshll.u32 %s1047_s19, 5 }
 0x171   : > { %s242_s26 = scalar_lea.vmem [#allocation8], %s644_s10  ;;  %s1281_s13 = scalar_lea.hbm %s1329_s4, %s651_s7 }
 0x172   : > { %v453_v10 = vadd.f32 %v452_v9, %v446_v5  ;;  %v473_v12 = vadd.f32 %v472_v8, %v466_v7  ;;  %s520_s8 = sshll.u32 %s242_s26, 4  ;;  %s491_s14 = scalar_lea.sflag [#allocation9], %s1165_s12  ;;  %s1283_s8 = int_to_ptr.vmem [resolvable:$true] %s520_s8 }
 0x173   : > { %s915_s20 = scalar_lea.vmem %s1283_s8, 32  ;;  %s1000_s19 = smov [#allocation8]  }
 0x174   : > { %v474_v14 = vadd.f32 %v473_v12, %v467_v11  ;;  %v454_v15 = vadd.f32 %v453_v10, %v447_v6  ;;  %p916_p10 = scmp.ne.s32.totalorder %s1283_s8, %s915_s20  ;;  %s919_s21 = sshll.u32 %s1000_s19, 4  ;;  %s920_s21 = int_to_ptr.vmem [resolvable:$false] %s919_s21 }
 0x175   : > { %s921_s23 = scalar_lea.vmem %s920_s21, 64  ;;  %p922_p7 = scmp.lt.s32.totalorder %s1283_s8, %s920_s21 }
 0x176   : > { %v455_v16 = vrot.slane %v454_v15, 4  ;;  %v475_v17 = vadd.f32 %v474_v14, %v468_v13  ;;  %p917_p13 = pnand %p916_p10, %p1117_p12  ;;  %p923_p9 = scmp.lt.s32.totalorder %s921_s23, %s915_s20 }
 0x178   : > { %v456_v18 = vadd.f32 %v455_v16, %v454_v15  ;;  %v476_v19 = vrot.slane %v475_v17, 4  ;;  %p918_p3 = pneg %p917_p13  ;;  %p924_p2 = por %p923_p9, %p922_p7 }
 0x17a   : > { %v457_v20 = vrot.slane %v456_v18, 2  ;;  %v477_v21 = vadd.f32 %v476_v19, %v475_v17  ;;  %p925_p0 = pnand %p924_p2, %p918_p3 }
 0x17c   : > { %v458_v22 = vadd.f32 %v457_v20, %v456_v18  ;;  %v478_v23 = vrot.slane %v477_v21, 2 }
 0x17e   : > { %v459_v24 = vrot.slane %v458_v22, 1  ;;  %v479_v25 = vadd.f32 %v478_v23, %v477_v21 }
 0x180   : > { %v480_v26 = vrot.slane %v479_v25, 1  ;;  %v460_v27 = vadd.f32 %v459_v24, %v458_v22 }
 0x182   : > { %v481_v28 = vadd.f32 %v480_v26, %v479_v25 }
 0x184   : > { %v483_v29 = vsel %vm482_vm8, %v460_v27, %v481_v28 }
 0x185   : > { %484 = vst [vmem:[%s242_s26] sm:$0x3] %v483_v29 }
 0x186   : > { %928 = shalt.err (!%p925_p0)
}
 0x187   : > { %s929_s12 = scalar_lea.hbm %s1281_s13, 32  ;;  %s933_s29 = scalar_lea.hbm %s1329_s4, 64 }
 0x188   : > { %p930_p5 = scmp.ne.s32.totalorder %s1281_s13, %s929_s12  ;;  %p934_p4 = scmp.lt.u32.totalorder %s1281_s13, %s1329_s4 }
 0x189   : > { %p935_p6 = scmp.lt.u32.totalorder %s933_s29, %s929_s12  ;;  %p937_p10 = scmp.lt.u32.totalorder %s929_s12, %s1281_s13 }
 0x18a   : > { %p931_p11 = pnand %p930_p5, %p1117_p12 }
 0x18b   : > { %p936_p8 = por %p935_p6, %p934_p4 }
 0x18c   : > { %p932_p1 = pneg %p931_p11 }
 0x18d   : > { %p938_p13 = por %p937_p10, %p936_p8 }
 0x18f   : > { %p939_p3 = pnand %p938_p13, %p932_p1 }
 0x191   : > { %942 = shalt.err (!%p939_p3)
}
 0x192   : > { %768 = dma.vmem_to_hbm [thread:$0]  (%p1117_p12), %s1283_s8, 32, %s1281_s13, %s491_s14  }
 0x193 PF: > { %s532_s10 = sand.u32 1, %s977_s15   ;;  %p1344_p7 = scmp.ne.s32.totalorder %s1334_s22, 0 }
 0x194   : > { %p1345_p9 = scmp.ge.s32.totalorder %s989_s18, 2  ;;  %s533_s7 = scalar_lea.sflag [#allocation4], %s532_s10 }
 0x196   : > { %p780_p2 = pnand %p1345_p9, %p1344_p7 }
 0x198   : > { %968 = dma.done.wait (!%p780_p2), %s533_s7, 1024  }
 0x199   : > { %970 = vsyncadd (!%p780_p2), %s533_s7, 4294966272  ;;  %s542_s26 = scalar_lea.sflag [#allocation9], %s532_s10 }
 0x19a   : > { %972 = dma.done.wait (!%p780_p2), %s542_s26, 32  }
 0x19b   : > { %974 = vsyncadd (!%p780_p2), %s542_s26, 4294967264  ;;  %p22_p12 = scmp.ge.s32.totalorder %s1082_s27, 4   ;;  %s1346_s15 = smov %s981_s16 }
 0x19c   : > { %s1347_s16 = smov %s985_s17  ;;  %s1348_s17 = smov %s1113_s24 }
 0x19d   : > { %s1349_s18 = smov %s1082_s27  ;;  %24 = sbr.rel (!%p22_p12) target bundleno = 8 (0x8), region = 98 }
 0x1a4   :  { %547 = vsyncpa [#allocation3], 1 }
 0x1a5   :  { %549 = vsyncpa [#allocation3 + $0x1], 1 }
 0x1a6   :  { %550 = vsyncpa [#allocation6], 1 }
 0x1a7   :  { %551 = vsyncpa [#allocation4], 1 }
 0x1a8   :  { %553 = vsyncpa [#allocation4 + $0x1], 1 }
 0x1a9   :  { %554 = vsyncpa [#allocation9], 1 }
 0x1aa   :  { %556 = vsyncpa [#allocation9 + $0x1], 1 }

</bundles_post_ra>
